<compile_context>
chip_gen: v7x
topology: tpu7x:2x2x1
jax: 0.10.0
libtpu: 0.0.40
codegen_flags: <defaults>
</compile_context>

<pallas_src>
import functools

import jax
import jax.numpy as jnp
from jax.experimental import pallas as pl
from jax.experimental.pallas import tpu as pltpu


_KS = (3, 4, 5)          # conv kernel heights; PyTorch padding = k - 1
_KMAX = max(_KS)         # 5
_PMAX = _KMAX - 1        # 4  (max sequence padding applied once on the host)
_NC_PAD = 128            # lane-dense kernel output width


def _kimcnn_kernel(xf_ref, wc_ref, bc_ref, mask_ref, wf_ref, bf_ref, out_ref):
    """One grid step processes `bb` batch rows, all refs in VMEM.

    xf_ref  : (bb*P, E)       zero-padded inputs, batch-major flat (P = S + 2*_PMAX)
    wc_ref  : (_KMAX*E, 3C)   fused conv weights; rows [t*E:(t+1)*E] multiply x_pad row l+t
    bc_ref  : (1, 3C)         fused conv bias
    mask_ref: (L, 3C)         0/1 validity mask (branch k valid for first S+k-1 positions)
    wf_ref  : (3C, _NC_PAD)   fc1 weight (transposed, zero-padded columns)
    bf_ref  : (1, _NC_PAD)    fc1 bias (zero-padded)
    out_ref : (bb, _NC_PAD)
    """
    bb = out_ref.shape[0]
    e = xf_ref.shape[1]
    c3 = wc_ref.shape[1]
    p = xf_ref.shape[0] // bb
    l = mask_ref.shape[0]                      # unified conv output length = P - (KMAX-1)

    xf = xf_ref[...]                           # (bb*P, E)

    # Fused conv for all three branches: KMAX shifted-accumulate MXU matmuls,
    # each (bb*P, E) @ (E, 3C), accumulated in f32.
    conv = jnp.dot(xf, wc_ref[0:e, :],
                   preferred_element_type=jnp.float32).reshape(bb, p, c3)[:, 0:l, :]
    for t in range(1, _KMAX):
        zt = jnp.dot(xf, wc_ref[t * e:(t + 1) * e, :],
                     preferred_element_type=jnp.float32).reshape(bb, p, c3)
        conv = conv + zt[:, t:t + l, :]

    conv = jnp.maximum(conv + bc_ref[...], 0.0)      # bias + ReLU, (bb, L, 3C)

    # Segmented max_pool1d: invalid tail positions of shorter branches are
    # zeroed; post-ReLU values are >= 0 so the per-branch max is unchanged.
    conv = conv * mask_ref[...]
    feat = jnp.max(conv, axis=1)                     # (bb, 3C)

    # TODO(synk): nn.Dropout is identity at inference; training-mode dropout not implemented.
    # fc1: single matmul, lane-dense (bb, 128) store.
    out_ref[...] = (jnp.dot(feat, wf_ref[...], preferred_element_type=jnp.float32)
                    + bf_ref[...])


# ------------------------- plain-JAX glue -------------------------


def init_params(key, embedding_dim=32, output_channel=16, num_classes=2):
    """Deterministic synthetic parameters matching KimCNN.__init__ shapes."""
    keys = jax.random.split(key, 8)
    params = {}
    for i, k in enumerate(_KS):
        params[f"conv{i + 1}_w"] = 0.05 * jax.random.normal(
            keys[2 * i], (output_channel, 1, k, embedding_dim), jnp.float32)
        params[f"conv{i + 1}_b"] = 0.05 * jax.random.normal(
            keys[2 * i + 1], (output_channel,), jnp.float32)
    params["fc_w"] = 0.05 * jax.random.normal(
        keys[6], (num_classes, 3 * output_channel), jnp.float32)
    params["fc_b"] = 0.05 * jax.random.normal(
        keys[7], (num_classes,), jnp.float32)
    return params


def prepare_fused_params(params, seq_len):
    """Fuse the three conv branches + fc1 into kernel-friendly slabs (done once)."""
    C, _, _, E = params["conv1_w"].shape
    nc = params["fc_b"].shape[0]
    S = seq_len
    P = S + 2 * _PMAX
    L = P - (_KMAX - 1)                       # = S + _KMAX - 1

    # Fused conv weight: branch k (kernel height k, padding k-1) occupies the
    # LAST k*E rows of its column block [j*C:(j+1)*C]; rows [t*E:(t+1)*E]
    # multiply x_pad row (l + t) in the shifted-accumulate loop.
    w_all = jnp.zeros((_KMAX * E, 3 * C), jnp.float32)
    b_all = []
    for j, k in enumerate(_KS):
        wk = params[f"conv{j + 1}_w"].reshape(C, k * E).T          # (k*E, C)
        w_all = w_all.at[(_KMAX - k) * E:, j * C:(j + 1) * C].set(wk)
        b_all.append(params[f"conv{j + 1}_b"])
    b_all = jnp.concatenate(b_all).reshape(1, 3 * C)

    # Per-branch validity mask for the segmented max-pool (branch k valid for
    # the first S + k - 1 unified positions).
    mask = jnp.zeros((L, 3 * C), jnp.float32)
    for j, k in enumerate(_KS):
        mask = mask.at[: S + k - 1, j * C:(j + 1) * C].set(1.0)

    # fc1, transposed and zero-padded to a lane-dense 128-wide output slab.
    wf = jnp.zeros((3 * C, _NC_PAD), jnp.float32).at[:, :nc].set(params["fc_w"].T)
    bf = jnp.zeros((1, _NC_PAD), jnp.float32).at[:, :nc].set(params["fc_b"])

    return {"w_all": w_all, "b_all": b_all, "mask": mask, "wf": wf, "bf": bf,
            "num_classes": nc}


@functools.partial(jax.jit, static_argnames=("num_classes",))
def kimcnn_forward(x, fused, *, num_classes):
    """x: (B, S, E) float; fused: output of prepare_fused_params."""
    B, S, E = x.shape
    C3 = fused["w_all"].shape[1]
    P = S + 2 * _PMAX                 # max-padded sequence length
    L = P - (_KMAX - 1)               # unified conv output length = S + _KMAX - 1

    # Batch blocking: one grid step per `block_b` rows; pad B if needed so the
    # grid divides evenly and the (8, 128) block constraint holds when nb > 1.
    if B <= 8:
        block_b, B_pad = B, B
    else:
        block_b = 8
        B_pad = ((B + block_b - 1) // block_b) * block_b
    nb = B_pad // block_b

    # Pad once with the max padding (and any batch padding), flatten batch-major.
    x_pad = jnp.pad(x.astype(jnp.float32),
                    ((0, B_pad - B), (_PMAX, _PMAX), (0, 0))).reshape(B_pad * P, E)

    out_padded = pl.pallas_call(
        _kimcnn_kernel,
        out_shape=jax.ShapeDtypeStruct((B_pad, _NC_PAD), jnp.float32),
        grid=(nb,),
        in_specs=[
            pl.BlockSpec((block_b * P, E), lambda i: (i, 0)),       # x (per batch block)
            pl.BlockSpec((_KMAX * E, C3), lambda i: (0, 0)),        # fused conv weight
            pl.BlockSpec((1, C3), lambda i: (0, 0)),                # fused conv bias
            pl.BlockSpec((L, C3), lambda i: (0, 0)),                # pool validity mask
            pl.BlockSpec((C3, _NC_PAD), lambda i: (0, 0)),          # fc1 weight
            pl.BlockSpec((1, _NC_PAD), lambda i: (0, 0)),           # fc1 bias
        ],
        out_specs=pl.BlockSpec((block_b, _NC_PAD), lambda i: (i, 0)),
        compiler_params=pltpu.CompilerParams(
            dimension_semantics=("parallel",)),
    )(x_pad, fused["w_all"], fused["b_all"], fused["mask"],
      fused["wf"], fused["bf"])

    return out_padded[:B, :num_classes]


def reference_forward(x, params):
    """Pure-JAX reference reproducing the PyTorch forward semantics."""
    B, S, E = x.shape
    feats = []
    for i, k in enumerate(_KS):
        p = k - 1
        w = params[f"conv{i + 1}_w"][:, 0]        # (C, k, E)
        b = params[f"conv{i + 1}_b"]              # (C,)
        xp = jnp.pad(x, ((0, 0), (p, p), (0, 0)))
        Lk = S + 2 * p - k + 1
        conv = jnp.stack(
            [jnp.einsum("bke,cke->bc", xp[:, t:t + k, :], w) + b for t in range(Lk)],
            axis=2)                               # (B, C, L)
        conv = jnp.maximum(conv, 0.0)
        feats.append(jnp.max(conv, axis=2))       # (B, C)
    feat = jnp.concatenate(feats, axis=1)         # (B, 3C)
    return feat @ params["fc_w"].T + params["fc_b"]


if __name__ == "__main__":
    # Small shapes consistent with the module: batch=2, seq=8, embedding_dim=32,
    # output_channel=16, num_classes=2.
    B, S, E = 2, 8, 32
    key = jax.random.PRNGKey(0)
    kx, kp = jax.random.split(key)
    x = jax.random.normal(kx, (B, S, E), jnp.float32)
    params = init_params(kp, embedding_dim=E, output_channel=16, num_classes=2)

    fused = prepare_fused_params(params, seq_len=S)
    out = jax.block_until_ready(
        kimcnn_forward(x, {k: v for k, v in fused.items() if k != "num_classes"},
                       num_classes=fused["num_classes"]))
    ref = jax.block_until_ready(reference_forward(x, params))

    assert out.shape == (B, 2), out.shape
    assert jnp.allclose(out, ref, atol=1e-4, rtol=1e-4), (out, ref)
    print("KERNEL_OK")
</pallas_src>

<mosaic_0001>
module attributes {stable_mosaic.version = 11 : i64} {
  func.func @_kimcnn_kernel(%arg0: i32, %arg1: memref<32x32xf32, #tpu.memory_space<vmem>>, %arg2: memref<160x48xf32, #tpu.memory_space<vmem>>, %arg3: memref<1x48xf32, #tpu.memory_space<vmem>>, %arg4: memref<12x48xf32, #tpu.memory_space<vmem>>, %arg5: memref<48x128xf32, #tpu.memory_space<vmem>>, %arg6: memref<1x128xf32, #tpu.memory_space<vmem>>, %arg7: memref<2x128xf32, #tpu.memory_space<vmem>>) attributes {dimension_semantics = [#tpu.dimension_semantics<parallel>], iteration_bounds = array<i64: 1>, scalar_prefetch = 0 : i64, scratch_operands = 0 : i64, tpu.core_type = #tpu.core_type<tc>, window_params = [{transform_indices = @transform_0, window_bounds = array<i64: 32, 32>}, {pipeline_mode = #tpu.pipeline_mode<synchronous>, transform_indices = @transform_1, window_bounds = array<i64: 160, 48>}, {pipeline_mode = #tpu.pipeline_mode<synchronous>, transform_indices = @transform_2, window_bounds = array<i64: 1, 48>}, {pipeline_mode = #tpu.pipeline_mode<synchronous>, transform_indices = @transform_3, window_bounds = array<i64: 12, 48>}, {pipeline_mode = #tpu.pipeline_mode<synchronous>, transform_indices = @transform_4, window_bounds = array<i64: 48, 128>}, {pipeline_mode = #tpu.pipeline_mode<synchronous>, transform_indices = @transform_5, window_bounds = array<i64: 1, 128>}, {transform_indices = @transform_6, window_bounds = array<i64: 2, 128>}]} {
    %c0 = arith.constant 0 : index
    %c0_0 = arith.constant 0 : index
    %0 = vector.load %arg1[%c0, %c0_0] : memref<32x32xf32, #tpu.memory_space<vmem>>, vector<32x32xf32>
    %c0_1 = arith.constant 0 : index
    %c0_2 = arith.constant 0 : index
    %1 = vector.load %arg2[%c0_1, %c0_2] : memref<160x48xf32, #tpu.memory_space<vmem>>, vector<32x48xf32>
    %cst = arith.constant dense<0.000000e+00> : vector<32x48xf32>
    %2 = tpu.matmul %0, %1, %cst {dimension_numbers = #tpu.dot_dimension_numbers<[1], [0], [0], [1], [0, 0, 1, 1], [], []>} : vector<32x32xf32>, vector<32x48xf32>, vector<32x48xf32> -> vector<32x48xf32>
    %3 = vector.shape_cast %2 : vector<32x48xf32> to vector<2x16x48xf32>
    %4 = vector.extract_strided_slice %3 {offsets = [0, 0, 0], sizes = [2, 12, 48], strides = [1, 1, 1]} : vector<2x16x48xf32> to vector<2x12x48xf32>
    %c32 = arith.constant 32 : index
    %c0_3 = arith.constant 0 : index
    %5 = vector.load %arg2[%c32, %c0_3] : memref<160x48xf32, #tpu.memory_space<vmem>>, vector<32x48xf32>
    %cst_4 = arith.constant dense<0.000000e+00> : vector<32x48xf32>
    %6 = tpu.matmul %0, %5, %cst_4 {dimension_numbers = #tpu.dot_dimension_numbers<[1], [0], [0], [1], [0, 0, 1, 1], [], []>} : vector<32x32xf32>, vector<32x48xf32>, vector<32x48xf32> -> vector<32x48xf32>
    %7 = vector.shape_cast %6 : vector<32x48xf32> to vector<2x16x48xf32>
    %8 = vector.extract_strided_slice %7 {offsets = [0, 1, 0], sizes = [2, 12, 48], strides = [1, 1, 1]} : vector<2x16x48xf32> to vector<2x12x48xf32>
    %9 = arith.addf %4, %8 : vector<2x12x48xf32>
    %c64 = arith.constant 64 : index
    %c0_5 = arith.constant 0 : index
    %10 = vector.load %arg2[%c64, %c0_5] : memref<160x48xf32, #tpu.memory_space<vmem>>, vector<32x48xf32>
    %cst_6 = arith.constant dense<0.000000e+00> : vector<32x48xf32>
    %11 = tpu.matmul %0, %10, %cst_6 {dimension_numbers = #tpu.dot_dimension_numbers<[1], [0], [0], [1], [0, 0, 1, 1], [], []>} : vector<32x32xf32>, vector<32x48xf32>, vector<32x48xf32> -> vector<32x48xf32>
    %12 = vector.shape_cast %11 : vector<32x48xf32> to vector<2x16x48xf32>
    %13 = vector.extract_strided_slice %12 {offsets = [0, 2, 0], sizes = [2, 12, 48], strides = [1, 1, 1]} : vector<2x16x48xf32> to vector<2x12x48xf32>
    %14 = arith.addf %9, %13 : vector<2x12x48xf32>
    %c96 = arith.constant 96 : index
    %c0_7 = arith.constant 0 : index
    %15 = vector.load %arg2[%c96, %c0_7] : memref<160x48xf32, #tpu.memory_space<vmem>>, vector<32x48xf32>
    %cst_8 = arith.constant dense<0.000000e+00> : vector<32x48xf32>
    %16 = tpu.matmul %0, %15, %cst_8 {dimension_numbers = #tpu.dot_dimension_numbers<[1], [0], [0], [1], [0, 0, 1, 1], [], []>} : vector<32x32xf32>, vector<32x48xf32>, vector<32x48xf32> -> vector<32x48xf32>
    %17 = vector.shape_cast %16 : vector<32x48xf32> to vector<2x16x48xf32>
    %18 = vector.extract_strided_slice %17 {offsets = [0, 3, 0], sizes = [2, 12, 48], strides = [1, 1, 1]} : vector<2x16x48xf32> to vector<2x12x48xf32>
    %19 = arith.addf %14, %18 : vector<2x12x48xf32>
    %c128 = arith.constant 128 : index
    %c0_9 = arith.constant 0 : index
    %20 = vector.load %arg2[%c128, %c0_9] : memref<160x48xf32, #tpu.memory_space<vmem>>, vector<32x48xf32>
    %cst_10 = arith.constant dense<0.000000e+00> : vector<32x48xf32>
    %21 = tpu.matmul %0, %20, %cst_10 {dimension_numbers = #tpu.dot_dimension_numbers<[1], [0], [0], [1], [0, 0, 1, 1], [], []>} : vector<32x32xf32>, vector<32x48xf32>, vector<32x48xf32> -> vector<32x48xf32>
    %22 = vector.shape_cast %21 : vector<32x48xf32> to vector<2x16x48xf32>
    %23 = vector.extract_strided_slice %22 {offsets = [0, 4, 0], sizes = [2, 12, 48], strides = [1, 1, 1]} : vector<2x16x48xf32> to vector<2x12x48xf32>
    %24 = arith.addf %19, %23 : vector<2x12x48xf32>
    %c0_11 = arith.constant 0 : index
    %c0_12 = arith.constant 0 : index
    %25 = vector.load %arg3[%c0_11, %c0_12] : memref<1x48xf32, #tpu.memory_space<vmem>>, vector<1x48xf32>
    %26 = vector.shape_cast %25 : vector<1x48xf32> to vector<1x1x48xf32>
    %27 = vector.broadcast %26 : vector<1x1x48xf32> to vector<2x12x48xf32>
    %28 = arith.addf %24, %27 : vector<2x12x48xf32>
    %cst_13 = arith.constant 0.000000e+00 : f32
    %29 = vector.broadcast %cst_13 : f32 to vector<2x12x48xf32>
    %30 = arith.maximumf %28, %29 : vector<2x12x48xf32>
    %c0_14 = arith.constant 0 : index
    %c0_15 = arith.constant 0 : index
    %31 = vector.load %arg4[%c0_14, %c0_15] : memref<12x48xf32, #tpu.memory_space<vmem>>, vector<12x48xf32>
    %32 = vector.shape_cast %31 : vector<12x48xf32> to vector<1x12x48xf32>
    %33 = vector.broadcast %32 : vector<1x12x48xf32> to vector<2x12x48xf32>
    %34 = arith.mulf %30, %33 : vector<2x12x48xf32>
    %cst_16 = arith.constant dense<0xFF800000> : vector<2x48xf32>
    %35 = vector.multi_reduction <maximumf>, %34, %cst_16 [1] : vector<2x12x48xf32> to vector<2x48xf32>
    %c0_17 = arith.constant 0 : index
    %c0_18 = arith.constant 0 : index
    %36 = vector.load %arg5[%c0_17, %c0_18] : memref<48x128xf32, #tpu.memory_space<vmem>>, vector<48x128xf32>
    %cst_19 = arith.constant dense<0.000000e+00> : vector<2x128xf32>
    %37 = tpu.matmul %35, %36, %cst_19 {dimension_numbers = #tpu.dot_dimension_numbers<[1], [0], [0], [1], [0, 0, 1, 1], [], []>} : vector<2x48xf32>, vector<48x128xf32>, vector<2x128xf32> -> vector<2x128xf32>
    %c0_20 = arith.constant 0 : index
    %c0_21 = arith.constant 0 : index
    %38 = vector.load %arg6[%c0_20, %c0_21] : memref<1x128xf32, #tpu.memory_space<vmem>>, vector<1x128xf32>
    %39 = vector.broadcast %38 : vector<1x128xf32> to vector<2x128xf32>
    %40 = arith.addf %37, %39 : vector<2x128xf32>
    %c0_22 = arith.constant 0 : index
    %c0_23 = arith.constant 0 : index
    %41 = vector.load %arg7[%c0_22, %c0_23] : memref<2x128xf32, #tpu.memory_space<vmem>>, vector<2x128xf32>
    tpu.vector_store %arg7[%c0_22, %c0_23], %40 {strides = array<i32>} : memref<2x128xf32, #tpu.memory_space<vmem>>, vector<2x128xf32>,
    return
  }
  func.func @transform_0(%arg0: i32) -> (i32, i32) {
    %c0_i32 = arith.constant 0 : i32
    %c0_i32_0 = arith.constant 0 : i32
    return %arg0, %c0_i32 : i32, i32
  }
  func.func @transform_1(%arg0: i32) -> (i32, i32) {
    %c0_i32 = arith.constant 0 : i32
    %c0_i32_0 = arith.constant 0 : i32
    %c0_i32_1 = arith.constant 0 : i32
    return %c0_i32, %c0_i32_0 : i32, i32
  }
  func.func @transform_2(%arg0: i32) -> (i32, i32) {
    %c0_i32 = arith.constant 0 : i32
    %c0_i32_0 = arith.constant 0 : i32
    %c0_i32_1 = arith.constant 0 : i32
    return %c0_i32, %c0_i32_0 : i32, i32
  }
  func.func @transform_3(%arg0: i32) -> (i32, i32) {
    %c0_i32 = arith.constant 0 : i32
    %c0_i32_0 = arith.constant 0 : i32
    %c0_i32_1 = arith.constant 0 : i32
    return %c0_i32, %c0_i32_0 : i32, i32
  }
  func.func @transform_4(%arg0: i32) -> (i32, i32) {
    %c0_i32 = arith.constant 0 : i32
    %c0_i32_0 = arith.constant 0 : i32
    %c0_i32_1 = arith.constant 0 : i32
    return %c0_i32, %c0_i32_0 : i32, i32
  }
  func.func @transform_5(%arg0: i32) -> (i32, i32) {
    %c0_i32 = arith.constant 0 : i32
    %c0_i32_0 = arith.constant 0 : i32
    %c0_i32_1 = arith.constant 0 : i32
    return %c0_i32, %c0_i32_0 : i32, i32
  }
  func.func @transform_6(%arg0: i32) -> (i32, i32) {
    %c0_i32 = arith.constant 0 : i32
    %c0_i32_0 = arith.constant 0 : i32
    return %arg0, %c0_i32 : i32, i32
  }
}

</mosaic_0001>

<bundles_post_ra>
// kernel: kimcnn_forward.1
= control target key start
LH: loop header
LB: loop body
LE: loop exit
PB: predicated region body
PF: predicated region fallthrough
CT: control target
= control target key end

     0   :  { %vm32_vm0 = vcmask 261120   ;;  %s1121_s0 = inlined_call_operand.vmem [shape: f32[32,32], index: 0, kind: input, shape index: {}]   ;;  %s1122_s1 = inlined_call_operand.vmem [shape: f32[160,48], index: 1, kind: input, shape index: {}]   ;;  %s1123_s2 = inlined_call_operand.vmem [shape: f32[1,48], index: 2, kind: input, shape index: {}]   ;;  %s1124_s3 = inlined_call_operand.vmem [shape: f32[12,48], index: 3, kind: input, shape index: {}]   ;;  %s1125_s4 = inlined_call_operand.vmem [shape: f32[48,128], index: 4, kind: input, shape index: {}]   ;;  %s1126_s5 = inlined_call_operand.vmem [shape: f32[1,128], index: 5, kind: input, shape index: {}]   ;;  %s1127_s6 = inlined_call_operand.hbm [shape: f32[2,128], index: 6, kind: output, shape index: {}]  }
   0x1   :  { %v28_v0 = vld [vmem:[%s1122_s1] sm:$0xff]  ;;  %v29_v1 = vld [vmem:[%s1122_s1 + $0x8] sm:$0xff]  ;;  %v30_v5 = vld [vmem:[%s1122_s1 + $0x10] sm:$0xff] }
   0x2   :  { %v130_v2 = vld [vmem:[%s1122_s1 + $0x20] sm:$0xff]  ;;  %v862_v3 = vpack.c.bf16 %v29_v1, %v28_v0  ;;  %v131_v4 = vld [vmem:[%s1122_s1 + $0x28] sm:$0xff]  ;;  %v31_v6 = vld [vmem:[%s1122_s1 + $0x18] sm:$0xff] }
   0x3   :  { %v870_v7 = vpack.c.bf16 %v131_v4, %v130_v2  ;;  %v866_v8 = vpack.c.bf16 %v31_v6, %v30_v5  ;;  %v132_v9 = vld [vmem:[%s1122_s1 + $0x30] sm:$0xff]  ;;  %v133_v10 = vld [vmem:[%s1122_s1 + $0x38] sm:$0xff]  ;;  %v24_v11 = vld [vmem:[%s1121_s0] sm:$0xff] }
   0x4   :  { %863 = vmatprep.subr.bf16.mxu0 %v862_v3  ;;  %v874_v12 = vpack.c.bf16 %v133_v10, %v132_v9  ;;  %785 = vmatprep.mubr.msk.f32.mxu0 %vm32_vm0, %v24_v11  ;;  %v238_v13 = vld [vmem:[%s1122_s1 + $0x40] sm:$0xff]  ;;  %v239_v14 = vld [vmem:[%s1122_s1 + $0x48] sm:$0xff]  ;;  %v240_v20 = vld [vmem:[%s1122_s1 + $0x50] sm:$0xff] }
   0x5   :  { %871 = vmatprep.subr.bf16.mxu1 %v870_v7  ;;  %865 = vmatpush3.bf16.msra.mxu0 %v862_v3  ;;  %v346_v15 = vld [vmem:[%s1122_s1 + $0x60] sm:$0xff]  ;;  %v347_v16 = vld [vmem:[%s1122_s1 + $0x68] sm:$0xff]  ;;  %v878_v17 = vpack.c.bf16 %v239_v14, %v238_v13  ;;  %v241_v21 = vld [vmem:[%s1122_s1 + $0x58] sm:$0xff] }
   0x6   :  { %873 = vmatpush3.bf16.msra.mxu1 %v870_v7  ;;  %867 = vmatprep.subr.bf16.mxu0 %v866_v8  ;;  %v886_v18 = vpack.c.bf16 %v347_v16, %v346_v15  ;;  %v25_v19 = vld [vmem:[%s1121_s0 + $0x8] sm:$0xff]  ;;  %v348_v22 = vld [vmem:[%s1122_s1 + $0x70] sm:$0xff]  ;;  %v349_v23 = vld [vmem:[%s1122_s1 + $0x78] sm:$0xff] }
   0x7   :  { %875 = vmatprep.subr.bf16.mxu1 %v874_v12  ;;  %799 = vmatprep.mubr.msk.f32.mxu1 %vm32_vm0, %v24_v11 }
   0x9   :  { %869 = vmatpush3.bf16.msra.mxu0 %v866_v8 }
   0xa   :  { %11 = vsyncpa [#allocation3], 0  ;;  %877 = vmatpush3.bf16.msra.mxu1 %v874_v12  ;;  %879 = vmatprep.subr.bf16.mxu0 %v878_v17  ;;  %v26_v24 = vld [vmem:[%s1121_s0 + $0x10] sm:$0xff]  ;;  %v882_v25 = vpack.c.bf16 %v241_v21, %v240_v20  ;;  %v454_v26 = vld [vmem:[%s1122_s1 + $0x80] sm:$0xff]  ;;  %v890_v28 = vpack.c.bf16 %v349_v23, %v348_v22  ;;  %v939_v37 = vmov 0.0|0.0   ;;  %vm940_vm1 = vmmov 0  }
   0xb   :  { %887 = vmatprep.subr.bf16.mxu1 %v886_v18  ;;  %v455_v27 = vld [vmem:[%s1122_s1 + $0x88] sm:$0xff]  ;;  %v27_v29 = vld [vmem:[%s1121_s0 + $0x18] sm:$0xff]  ;;  %v456_v31 = vld [vmem:[%s1122_s1 + $0x90] sm:$0xff]  ;;  %v941_v40 = vmov 0.0   ;;  %vm223_vm2 = vcmask 1046528   ;;  %vm331_vm3 = vcmask 1045504  }
   0xc   :  { %786 = vmatmul.mubr.msk.f32.vlgmr.msra.gmra.mrb[0].mxu0 %vm32_vm0, %v25_v19  ;;  %v894_v30 = vpack.c.bf16 %v455_v27, %v454_v26  ;;  %v457_v32 = vld [vmem:[%s1122_s1 + $0x98] sm:$0xff]  ;;  %v603_v34 = vld [vmem:[%s1125_s4] sm:$0xff]  ;;  %v604_v35 = vld [vmem:[%s1125_s4 + $0x8] sm:$0xff]  ;;  %vm439_vm4 = vcmask 1044480   ;;  %vm547_vm5 = vcmask 1043456   ;;  %vm585_vm6 = vcmask 388096  }
   0xd   :  { %800 = vmatmul.mubr.msk.f32.vlgmr.msra.gmra.mrb[0].mxu1 %vm32_vm0, %v25_v19  ;;  %881 = vmatpush3.bf16.msra.mxu0 %v878_v17  ;;  %v898_v33 = vpack.c.bf16 %v457_v32, %v456_v31  ;;  %v605_v36 = vld [vmem:[%s1125_s4 + $0x10] sm:$0xff]  ;;  %v903_v38 = vpack.c.bf16 %v604_v35, %v603_v34  ;;  %v606_v39 = vld [vmem:[%s1125_s4 + $0x18] sm:$0xff]  ;;  %v607_v42 = vld [vmem:[%s1125_s4 + $0x20] sm:$0xff]  ;;  %vm583_vm7 = vcmask 392192   ;;  %vm618_vm8 = vcmask 1041409   ;;  %s942_s12 = smov [#allocation2]  }
   0xe   :  { %788 = vmatprep.mubr.msk.f32.mxu0 %vm32_vm0, %v26_v24  ;;  %802 = vmatprep.mubr.msk.f32.mxu1 %vm32_vm0, %v26_v24  ;;  %v906_v41 = vpack.c.bf16 %v606_v39, %v605_v36  ;;  %v608_v43 = vld [vmem:[%s1125_s4 + $0x28] sm:$0xff]  ;;  %s699_s13 = sshll.u32 %s942_s12, 4  ;;  %s700_s13 = int_to_ptr.vmem [resolvable:$true] %s699_s13 }
   0xf   :  { %889 = vmatpush3.bf16.msra.mxu1 %v886_v18  ;;  %883 = vmatprep.subr.bf16.mxu0 %v882_v25  ;;  %v909_v44 = vpack.c.bf16 %v608_v43, %v607_v42  ;;  %v578_v39 = vld [vmem:[%s1124_s3 + $0x8] sm:$0xf]  ;;  %s915_s14 = scalar_lea.vmem %s700_s13, 32  ;;  %p920_p1 = scmp.lt.s32.totalorder %s700_s13, %s700_s13 }
  0x10   :  { %789 = vmatmul.mubr.msk.f32.gmra.mrb[2].mxu0 %vm32_vm0, %v27_v29  ;;  %891 = vmatprep.subr.bf16.mxu1 %v890_v28  ;;  %p916_p0 = scmp.ne.s32.totalorder %s700_s13, %s915_s14  ;;  %p921_p2 = scmp.lt.s32.totalorder %s915_s14, %s915_s14 }
  0x11   :  { %803 = vmatmul.mubr.msk.f32.gmra.mrb[2].mxu1 %vm32_vm0, %v27_v29  ;;  %885 = vmatpush3.bf16.msra.mxu0 %v882_v25 }
  0x12   :  { %813 = vmatprep.mubr.msk.f32.mxu0 %vm32_vm0, %v24_v11  ;;  %895 = vmatprep.subr.bf16.mxu0 %v894_v30  ;;  %p922_p3 = por %p921_p2, %p920_p1 }
  0x13   :  { %893 = vmatpush3.bf16.msra.mxu1 %v890_v28  ;;  %827 = vmatprep.mubr.msk.f32.mxu1 %vm32_vm0, %v24_v11 }
  0x14   :  { %814 = vmatmul.mubr.msk.f32.vlgmr.msra.gmra.mrb[4].mxu0 %vm32_vm0, %v25_v19  ;;  %902 = vmatprep.subr.bf16.mxu1 %v939_v37  ;;  %p923_p4 = pnand %p922_p3, %p916_p0 }
  0x15   :  { %897 = vmatpush3.bf16.msra.mxu0 %v894_v30  ;;  %816 = vmatprep.mubr.msk.f32.mxu0 %vm32_vm0, %v26_v24 }
  0x16   :  { %828 = vmatmul.mubr.msk.f32.vlgmr.msra.gmra.mrb[4].mxu1 %vm32_vm0, %v25_v19  ;;  %899 = vmatprep.subr.bf16.mxu0 %v898_v33 }
  0x17   :  { %830 = vmatprep.mubr.msk.f32.mxu1 %vm32_vm0, %v26_v24  ;;  %904 = vmatpush3.bf16.msra.mxu1 %v903_v38 }
  0x18   :  { %817 = vmatmul.mubr.msk.f32.gmra.mrb[6].mxu0 %vm32_vm0, %v27_v29  ;;  %905 = vmatprep.subr.bf16.mxu1 %v939_v37 }
  0x19   :  { %901 = vmatpush3.bf16.msra.mxu0 %v898_v33  ;;  %841 = vmatprep.mubr.msk.f32.mxu0 %vm32_vm0, %v24_v11 }
  0x1a   :  { %831 = vmatmul.mubr.msk.f32.gmra.mrb[6].mxu1 %vm32_vm0, %v27_v29 }
  0x1b   :  { %859 = vmatprep.mubr.msk.f32.mxu1 %vm940_vm1, %v941_v40  ;;  %907 = vmatpush3.bf16.msra.mxu1 %v906_v41 }
  0x1c   :  { %842 = vmatmul.mubr.msk.f32.vlgmr.msra.gmra.mrb[8].mxu0 %vm32_vm0, %v25_v19  ;;  %908 = vmatprep.subr.bf16.mxu1 %v939_v37 }
  0x1d   :  { %844 = vmatprep.mubr.msk.f32.mxu0 %vm32_vm0, %v26_v24 }
  0x1f   :  { %910 = vmatpush3.bf16.msra.mxu1 %v909_v44  ;;  %v577_v44 = vld [vmem:[%s1124_s3] sm:$0xff] }
  0x20   :  { %845 = vmatmul.mubr.msk.f32.gmra.mrb[10].mxu0 %vm32_vm0, %v27_v29  ;;  %v727_v29 = vld [vmem:[%s1123_s2] ss:$0 sm:$0xff] }
  0xdf   :  { %v787_v45 = vpop.f32.mrb[0].mxu0 }
  0xe0   :  { %v801_v46 = vpop.f32.mrb[0].mxu1  ;;  %v111_v47 = vpop.f32.mrb[1].mxu0 }
  0xe1   :  { %v225_v48 = vrot.slane %v801_v46, 1  ;;  %v200_v49 = vpop.f32.mrb[1].mxu1 }
  0xe2   :  { %v224_v50 = vrot.slane %v200_v49, 1 }
  0xe3   :  { %v235_v51 = vadd.f32 %v787_v45, %v225_v48  ;;  %v790_v52 = vpop.f32.mrb[2].mxu0 }
  0xe4   :  { %v226_v53 = vsel %vm223_vm2, %v224_v50, %v225_v48  ;;  %v804_v54 = vpop.f32.mrb[2].mxu1  ;;  %v121_v55 = vpop.f32.mrb[3].mxu0 }
  0xe5   :  { %v234_v56 = vadd.f32 %v226_v53, %v111_v47  ;;  %v228_v57 = vrot.slane %v804_v54, 1  ;;  %v210_v58 = vpop.f32.mrb[3].mxu1 }
  0xe6   :  { %v227_v59 = vrot.slane %v210_v58, 1 }
  0xe7   :  { %v237_v60 = vadd.f32 %v790_v52, %v228_v57  ;;  %v815_v61 = vpop.f32.mrb[4].mxu0 }
  0xe8   :  { %v229_v62 = vsel %vm223_vm2, %v227_v59, %v228_v57  ;;  %v333_v63 = vrot.slane %v815_v61, 2  ;;  %v308_v0 = vpop.f32.mrb[5].mxu0 }
  0xe9   :  { %v236_v1 = vadd.f32 %v229_v62, %v121_v55  ;;  %v332_v2 = vrot.slane %v308_v0, 2  ;;  %v829_v3 = vpop.f32.mrb[4].mxu1 }
  0xea   :  { %v343_v4 = vadd.f32 %v333_v63, %v235_v51  ;;  %v441_v5 = vrot.slane %v829_v3, 3  ;;  %v416_v6 = vpop.f32.mrb[5].mxu1 }
  0xeb   :  { %v334_v7 = vsel %vm331_vm3, %v332_v2, %v333_v63  ;;  %v440_v8 = vrot.slane %v416_v6, 3  ;;  %v818_v9 = vpop.f32.mrb[6].mxu0 }
  0xec   :  { %v342_v10 = vadd.f32 %v334_v7, %v234_v56  ;;  %v451_v11 = vadd.f32 %v441_v5, %v343_v4  ;;  %v336_v12 = vrot.slane %v818_v9, 2  ;;  %v318_v13 = vpop.f32.mrb[7].mxu0 }
  0xed   :  { %v442_v14 = vsel %vm439_vm4, %v440_v8, %v441_v5  ;;  %v335_v15 = vrot.slane %v318_v13, 2  ;;  %v832_v16 = vpop.f32.mrb[6].mxu1 }
  0xee   :  { %v450_v17 = vadd.f32 %v442_v14, %v342_v10  ;;  %v345_v18 = vadd.f32 %v336_v12, %v237_v60  ;;  %v444_v19 = vrot.slane %v832_v16, 3  ;;  %v426_v20 = vpop.f32.mrb[7].mxu1 }
  0xef   :  { %v337_v21 = vsel %vm331_vm3, %v335_v15, %v336_v12  ;;  %v443_v22 = vrot.slane %v426_v20, 3  ;;  %v843_v23 = vpop.f32.mrb[8].mxu0 }
  0xf0   :  { %v344_v24 = vadd.f32 %v337_v21, %v236_v1  ;;  %v453_v25 = vadd.f32 %v444_v19, %v345_v18  ;;  %v549_v26 = vrot.slane %v843_v23, 4  ;;  %v524_v27 = vpop.f32.mrb[9].mxu0 }
  0xf1   :  { %v445_v28 = vsel %vm439_vm4, %v443_v22, %v444_v19  ;;  %v548_v30 = vrot.slane %v524_v27, 4 }
  0xf2   :  { %v452_v31 = vadd.f32 %v445_v28, %v344_v24  ;;  %v559_v32 = vadd.f32 %v549_v26, %v451_v11  ;;  %v728_v11 = vld [vmem:[%s1126_s5] ss:$0 sm:$0xff] }
  0xf3   :  { %v550_v33 = vsel %vm547_vm5, %v548_v30, %v549_v26  ;;  %v846_v34 = vpop.f32.mrb[10].mxu0 }
  0xf4   :  { %v570_v35 = vadd.f32 %v727_v29, %v559_v32  ;;  %v558_v36 = vadd.f32 %v550_v33, %v450_v17  ;;  %v552_v37 = vrot.slane %v846_v34, 4  ;;  %v534_v38 = vpop.f32.mrb[11].mxu0 }
  0xf5   :  { %v551_v40 = vrot.slane %v534_v38, 4 }
  0xf6   :  { %v574_v41 = vmax.f32 %v570_v35, 0.0  ;;  %v569_v42 = vadd.f32 %v727_v29, %v558_v36  ;;  %v561_v43 = vadd.f32 %v552_v37, %v453_v25 }
  0xf7   :  { %v553_v45 = vsel %vm547_vm5, %v551_v40, %v552_v37 }
  0xf8   :  { %v580_v46 = vmul.f32 %v578_v39, %v574_v41  ;;  %v573_v47 = vmax.f32 %v569_v42, 0.0  ;;  %v572_v48 = vadd.f32 %v727_v29, %v561_v43  ;;  %v560_v49 = vadd.f32 %v553_v45, %v452_v31 }
  0xfa   :  { %v579_v50 = vmul.f32 %v577_v44, %v573_v47  ;;  %v576_v51 = vmax.f32 %v572_v48, 0.0  ;;  %v571_v52 = vadd.f32 %v727_v29, %v560_v49  ;;  %v586_v53 = vsel %vm585_vm6, %v580_v46, -inf }
  0xfc   :  { %v582_v54 = vmul.f32 %v578_v39, %v576_v51  ;;  %v575_v55 = vmax.f32 %v571_v52, 0.0  ;;  %v584_v56 = vsel %vm583_vm7, %v579_v50, -inf }
  0xfd   :  { %v587_v57 = vmax.f32 %v584_v56, %v586_v53 }
  0xfe   :  { %v581_v58 = vmul.f32 %v577_v44, %v575_v55  ;;  %v595_v60 = vsel %vm585_vm6, %v582_v54, -inf }
  0xff   :  { %v588_v59 = vrot.slane %v587_v57, 4 }
 0x100   :  { %v594_v61 = vsel %vm583_vm7, %v581_v58, -inf }
 0x101   :  { %v589_v62 = vmax.f32 %v587_v57, %v588_v59  ;;  %v596_v63 = vmax.f32 %v594_v61, %v595_v60 }
 0x103   :  { %v590_v0 = vrot.slane %v589_v62, 2  ;;  %v597_v1 = vrot.slane %v596_v63, 4 }
 0x105   :  { %v591_v2 = vmax.f32 %v589_v62, %v590_v0  ;;  %v598_v3 = vmax.f32 %v596_v63, %v597_v1 }
 0x107   :  { %v599_v4 = vrot.slane %v598_v3, 2  ;;  %v592_v5 = vrot.slane %v591_v2, 1 }
 0x109   :  { %v600_v6 = vmax.f32 %v598_v3, %v599_v4  ;;  %v593_v8 = vmax.f32 %v591_v2, %v592_v5 }
 0x10b   :  { %v601_v7 = vrot.slane %v600_v6, 1 }
 0x10d   :  { %v602_v9 = vmax.f32 %v600_v6, %v601_v7 }
 0x10f   :  { %v619_v10 = vsel %vm618_vm8, %v602_v9, %v593_v8 }
 0x110   :  { %860 = vmatmul.mubr.msk.f32.vlgmr.msra.gmra.mrb[8].mxu1 %vm583_vm7, %v619_v10 }
 0x1e3   :  { %v688_v12 = vpop.f32.mrb[8].mxu1 }
 0x1e4   :  { %v689_v13 = vadd.f32 %v728_v11, %v688_v12  ;;  %v861_v14 = vpop.f32.mrb[9].mxu1 }
 0x1e6   :  { %692 = vst [vmem:[#allocation2] sm:$0x3] %v689_v13 }
 0x1e7   :  { %926 = shalt.err (!%p923_p4)
}
 0x1e8   :  { %s927_s17 = scalar_lea.hbm %s1127_s6, 32 }
 0x1e9   :  { %p928_p5 = scmp.ne.s32.totalorder %s1127_s6, %s927_s17  ;;  %p931_p6 = scmp.lt.u32.totalorder %s927_s17, %s1127_s6 }
 0x1eb   :  { %p933_p7 = pnand %p931_p6, %p928_p5 }
 0x1ed   :  { %936 = shalt.err (!%p933_p7)
}
 0x1ee   :  { %702 = dma.vmem_to_hbm [thread:$0]  %s700_s13, 32, %s1127_s6, [#allocation3]  }
 0x1ef   :  { %937 = dma.done.wait [#allocation3], 32  }
 0x1f0   :  { %938 = vsyncadd [#allocation3], 4294967264 }
 0x1f1   :  { %706 = vsyncpa [#allocation3], 1 }

</bundles_post_ra>
